<compile_context>
chip_gen: v6e
topology: v6e:2x2x1
jax: 0.10.0
libtpu: 0.0.40
codegen_flags: <defaults>
</compile_context>

<pallas_src>
import functools

import jax
import jax.numpy as jnp
from jax.experimental import pallas as pl
from jax.experimental.pallas import tpu as pltpu

# Hyper-parameters from the module __init__ (no learnable weights in this module).
LAMBDA_REG = 0.3
NUM_BINS = 10
RANGE_MIN = 7.0
RANGE_MAX = 15.0

_LANES = 128
_MAX_TILE_ROWS = 1024          # 1024*128*4 B = 512 KiB per input tile
_NUM_CORES = 2                 # v7x has 2 TensorCores; extra core is a no-op elsewhere


def _round_up(x, m):
    return ((x + m - 1) // m) * m


def _partials_kernel(yt_ref, yp_ref, sse_ref, hist_ref, *,
                     total_rows, tile_rows, steps_per_core,
                     num_bins, range_min, range_max):
    c = pl.program_id(0)          # core index ("parallel")
    s = pl.program_id(1)          # step within core ("arbitrary", accumulation axis)

    @pl.when(s == 0)
    def _init():
        sse_ref[...] = jnp.zeros_like(sse_ref)
        hist_ref[...] = jnp.zeros_like(hist_ref)

    yt = yt_ref[...].astype(jnp.float32)
    yp = yp_ref[...].astype(jnp.float32)

    # Validity mask: handles the ragged last block and the clamped overshoot blocks
    # of the second core.  Based on the UNCLAMPED block index so duplicate reads
    # contribute nothing.
    blk = c * steps_per_core + s
    row0 = blk * tile_rows
    row_ids = row0 + jax.lax.broadcasted_iota(jnp.int32, (tile_rows, _LANES), 0)
    valid = row_ids < total_rows

    # --- SSE: per-lane partial sums (sublane reduce only; cross-lane reduce in wrapper)
    d = jnp.where(valid, yt - yp, 0.0)
    sse_ref[0] += jnp.sum(d * d, axis=0, keepdims=True)          # (1, 128)

    # --- Histogram (torch.histc semantics): outside [min, max] ignored, ==max -> last bin.
    # Per-lane counts, one vectorized accumulator update per tile.
    scale = float(num_bins) / (range_max - range_min)
    idx = jnp.floor((yp - range_min) * scale)
    idx = jnp.clip(idx, 0.0, float(num_bins - 1))
    in_range = valid & (yp >= range_min) & (yp <= range_max)

    counts = jnp.concatenate(
        [jnp.sum(jnp.where(in_range & (idx == float(b)), 1.0, 0.0),
                 axis=0, keepdims=True)                            # (1, 128) per bin
         for b in range(num_bins)],
        axis=0)                                                    # (num_bins, 128)
    hist_ref[0] += counts


def custom_loss_with_uniformity(y_true, y_pred,
                                lambda_reg=LAMBDA_REG, num_bins=NUM_BINS,
                                range_min=RANGE_MIN, range_max=RANGE_MAX):
    assert y_true.shape == y_pred.shape
    flat_t = y_true.reshape(-1)          # native dtype, no upcast in the wrapper
    flat_p = y_pred.reshape(-1)
    n = flat_t.shape[0]

    # Only pad (tiny, <128 elems) when N isn't lane-aligned; fill is identical in both
    # arrays (zero SSE) and outside [range_min, range_max] (ignored by the histogram).
    # TODO(synk): a fully copy-free path for N % 128 != 0 would need 1-D blocks.
    pad = (-n) % _LANES
    if pad:
        fill = jnp.full((pad,), range_min - 1.0, flat_t.dtype)
        flat_t = jnp.concatenate([flat_t, fill])
        flat_p = jnp.concatenate([flat_p, fill])

    rows = flat_t.shape[0] // _LANES
    yt2d = flat_t.reshape(rows, _LANES)   # free reshape of a contiguous array
    yp2d = flat_p.reshape(rows, _LANES)

    tile_rows = min(_MAX_TILE_ROWS, _round_up(rows, 8))
    total_blocks = pl.cdiv(rows, tile_rows)
    steps_per_core = pl.cdiv(total_blocks, _NUM_CORES)

    def in_map(c, s):
        blk = c * steps_per_core + s
        # Clamp to the last valid block; the kernel masks the duplicate read.
        return (jnp.minimum(blk, total_blocks - 1), 0)

    kernel = functools.partial(
        _partials_kernel,
        total_rows=rows, tile_rows=tile_rows, steps_per_core=steps_per_core,
        num_bins=int(num_bins), range_min=float(range_min), range_max=float(range_max))

    sse_parts, hist_parts = pl.pallas_call(
        kernel,
        out_shape=(
            jax.ShapeDtypeStruct((_NUM_CORES, 1, _LANES), jnp.float32),
            jax.ShapeDtypeStruct((_NUM_CORES, int(num_bins), _LANES), jnp.float32),
        ),
        grid_spec=pltpu.PrefetchScalarGridSpec(
            num_scalar_prefetch=0,
            grid=(_NUM_CORES, steps_per_core),
            in_specs=[
                pl.BlockSpec((tile_rows, _LANES), in_map),
                pl.BlockSpec((tile_rows, _LANES), in_map),
            ],
            out_specs=(
                pl.BlockSpec((1, 1, _LANES), lambda c, s: (c, 0, 0)),
                pl.BlockSpec((1, int(num_bins), _LANES), lambda c, s: (c, 0, 0)),
            )),
        compiler_params=pltpu.CompilerParams(
            dimension_semantics=("parallel", "arbitrary")),
    )(yt2d, yp2d)

    # Tiny epilogue in plain JAX: cross-lane/cross-core reduce + MSE/KL combine.
    sse = jnp.sum(sse_parts)
    hist = jnp.sum(hist_parts, axis=(0, 2))            # (num_bins,)
    mse = sse / jnp.float32(n)
    hist_n = hist / jnp.sum(hist)
    target = 1.0 / float(num_bins)
    penalty = jnp.sum(hist_n * jnp.log(hist_n / target + 1e-8))
    return mse + float(lambda_reg) * penalty


def _reference(y_true, y_pred):
    """Pure-JAX replica of the PyTorch forward for correctness checking."""
    mse = jnp.mean((y_true - y_pred) ** 2)
    yp = y_pred.reshape(-1)
    scale = NUM_BINS / (RANGE_MAX - RANGE_MIN)
    idx = jnp.clip(jnp.floor((yp - RANGE_MIN) * scale), 0, NUM_BINS - 1).astype(jnp.int32)
    weight = jnp.where((yp >= RANGE_MIN) & (yp <= RANGE_MAX), 1.0, 0.0)
    hist = jnp.zeros((NUM_BINS,), jnp.float32).at[idx].add(weight)
    hist_n = hist / jnp.sum(hist)
    penalty = jnp.sum(hist_n * jnp.log(hist_n / (1.0 / NUM_BINS) + 1e-8))
    return mse + LAMBDA_REG * penalty


if __name__ == "__main__":
    key = jax.random.PRNGKey(0)
    k1, k2 = jax.random.split(key)
    shape = (2, 4, 16, 16)  # small NCHW-like input; values straddle the [7, 15] histc range
    y_true = jax.random.uniform(k1, shape, jnp.float32, minval=6.0, maxval=16.0)
    y_pred = jax.random.uniform(k2, shape, jnp.float32, minval=6.0, maxval=16.0)

    loss = jax.block_until_ready(custom_loss_with_uniformity(y_true, y_pred))
    ref = jax.block_until_ready(_reference(y_true, y_pred))
    assert jnp.allclose(loss, ref, rtol=1e-4, atol=1e-5), (loss, ref)
    print("KERNEL_OK")
</pallas_src>

<mosaic_0001>
module attributes {stable_mosaic.version = 11 : i64} {
  func.func @_partials_kernel(%arg0: i32, %arg1: i32, %arg2: memref<16x128xf32, #tpu.memory_space<vmem>>, %arg3: memref<16x128xf32, #tpu.memory_space<vmem>>, %arg4: memref<1x1x128xf32, #tpu.memory_space<vmem>>, %arg5: memref<1x10x128xf32, #tpu.memory_space<vmem>>) attributes {dimension_semantics = [#tpu.dimension_semantics<parallel>, #tpu.dimension_semantics<arbitrary>], iteration_bounds = array<i64: 2, 1>, scalar_prefetch = 0 : i64, scratch_operands = 0 : i64, tpu.core_type = #tpu.core_type<tc>, window_params = [{transform_indices = @transform_0, window_bounds = array<i64: 16, 128>}, {transform_indices = @transform_1, window_bounds = array<i64: 16, 128>}, {transform_indices = @transform_2, window_bounds = array<i64: 1, 1, 128>}, {transform_indices = @transform_3, window_bounds = array<i64: 1, 10, 128>}]} {
    %c0_i32 = arith.constant 0 : i32
    %0 = arith.cmpi eq, %arg1, %c0_i32 : i32
    %1 = arith.extui %0 : i1 to i32
    %c0_i32_0 = arith.constant 0 : i32
    %2 = arith.cmpi ne, %1, %c0_i32_0 : i32
    scf.if %2 {
      %cst_64 = arith.constant 0.000000e+00 : f32
      %127 = vector.broadcast %cst_64 : f32 to vector<1x1x128xf32>
      %c0_65 = arith.constant 0 : index
      %c0_66 = arith.constant 0 : index
      %c0_67 = arith.constant 0 : index
      %128 = vector.load %arg4[%c0_65, %c0_66, %c0_67] : memref<1x1x128xf32, #tpu.memory_space<vmem>>, vector<1x1x128xf32>
      tpu.vector_store %arg4[%c0_65, %c0_66, %c0_67], %127 {strides = array<i32>} : memref<1x1x128xf32, #tpu.memory_space<vmem>>, vector<1x1x128xf32>,
      %cst_68 = arith.constant 0.000000e+00 : f32
      %129 = vector.broadcast %cst_68 : f32 to vector<1x10x128xf32>
      %c0_69 = arith.constant 0 : index
      %c0_70 = arith.constant 0 : index
      %c0_71 = arith.constant 0 : index
      %130 = vector.load %arg5[%c0_69, %c0_70, %c0_71] : memref<1x10x128xf32, #tpu.memory_space<vmem>>, vector<1x10x128xf32>
      tpu.vector_store %arg5[%c0_69, %c0_70, %c0_71], %129 {strides = array<i32>} : memref<1x10x128xf32, #tpu.memory_space<vmem>>, vector<1x10x128xf32>,
    } else {
    }
    %c0 = arith.constant 0 : index
    %c0_1 = arith.constant 0 : index
    %3 = vector.load %arg2[%c0, %c0_1] : memref<16x128xf32, #tpu.memory_space<vmem>>, vector<16x128xf32>
    %c0_2 = arith.constant 0 : index
    %c0_3 = arith.constant 0 : index
    %4 = vector.load %arg3[%c0_2, %c0_3] : memref<16x128xf32, #tpu.memory_space<vmem>>, vector<16x128xf32>
    %c1_i32 = arith.constant 1 : i32
    %5 = arith.muli %arg0, %c1_i32 : i32
    %6 = arith.addi %5, %arg1 : i32
    %c16_i32 = arith.constant 16 : i32
    %7 = arith.muli %6, %c16_i32 : i32
    %8 = tpu.iota {dimensions = array<i32: 0>} : vector<16x128xi32>
    %9 = vector.broadcast %7 : i32 to vector<16x128xi32>
    %10 = arith.addi %9, %8 : vector<16x128xi32>
    %c16_i32_4 = arith.constant 16 : i32
    %11 = vector.broadcast %c16_i32_4 : i32 to vector<16x128xi32>
    %12 = arith.cmpi slt, %10, %11 : vector<16x128xi32>
    %13 = arith.subf %3, %4 : vector<16x128xf32>
    %cst = arith.constant 0.000000e+00 : f32
    %14 = vector.broadcast %cst : f32 to vector<16x128xf32>
    %15 = arith.select %12, %13, %14 : vector<16x128xi1>, vector<16x128xf32>
    %c0_5 = arith.constant 0 : index
    %c0_6 = arith.constant 0 : index
    %c0_7 = arith.constant 0 : index
    %16 = vector.load %arg4[%c0_5, %c0_6, %c0_7] : memref<1x1x128xf32, #tpu.memory_space<vmem>>, vector<1x1x128xf32>
    %17 = vector.shape_cast %16 : vector<1x1x128xf32> to vector<1x128xf32>
    %18 = arith.mulf %15, %15 : vector<16x128xf32>
    %cst_8 = arith.constant dense<0.000000e+00> : vector<128xf32>
    %19 = vector.multi_reduction <add>, %18, %cst_8 [0] : vector<16x128xf32> to vector<128xf32>
    %20 = vector.shape_cast %19 : vector<128xf32> to vector<1x128xf32>
    %21 = arith.addf %17, %20 : vector<1x128xf32>
    %c0_9 = arith.constant 0 : index
    %c0_10 = arith.constant 0 : index
    %c0_11 = arith.constant 0 : index
    %22 = vector.load %arg4[%c0_9, %c0_10, %c0_11] : memref<1x1x128xf32, #tpu.memory_space<vmem>>, vector<1x1x128xf32>
    %23 = vector.shape_cast %22 : vector<1x1x128xf32> to vector<1x128xf32>
    %24 = vector.shape_cast %21 : vector<1x128xf32> to vector<1x1x128xf32>
    tpu.vector_store %arg4[%c0_9, %c0_10, %c0_11], %24 {strides = array<i32>} : memref<1x1x128xf32, #tpu.memory_space<vmem>>, vector<1x1x128xf32>,
    %cst_12 = arith.constant 7.000000e+00 : f32
    %25 = vector.broadcast %cst_12 : f32 to vector<16x128xf32>
    %26 = arith.subf %4, %25 : vector<16x128xf32>
    %cst_13 = arith.constant 1.250000e+00 : f32
    %27 = vector.broadcast %cst_13 : f32 to vector<16x128xf32>
    %28 = arith.mulf %26, %27 : vector<16x128xf32>
    %29 = math.floor %28 : vector<16x128xf32>
    %cst_14 = arith.constant 0.000000e+00 : f32
    %cst_15 = arith.constant 9.000000e+00 : f32
    %30 = vector.broadcast %cst_14 : f32 to vector<16x128xf32>
    %31 = arith.maximumf %30, %29 : vector<16x128xf32>
    %32 = vector.broadcast %cst_15 : f32 to vector<16x128xf32>
    %33 = arith.minimumf %32, %31 : vector<16x128xf32>
    %cst_16 = arith.constant 7.000000e+00 : f32
    %34 = vector.broadcast %cst_16 : f32 to vector<16x128xf32>
    %35 = arith.cmpf oge, %4, %34 : vector<16x128xf32>
    %36 = arith.andi %12, %35 : vector<16x128xi1>
    %cst_17 = arith.constant 1.500000e+01 : f32
    %37 = vector.broadcast %cst_17 : f32 to vector<16x128xf32>
    %38 = arith.cmpf ole, %4, %37 : vector<16x128xf32>
    %39 = arith.andi %36, %38 : vector<16x128xi1>
    %cst_18 = arith.constant 0.000000e+00 : f32
    %40 = vector.broadcast %cst_18 : f32 to vector<16x128xf32>
    %41 = arith.cmpf oeq, %33, %40 : vector<16x128xf32>
    %42 = arith.andi %39, %41 : vector<16x128xi1>
    %cst_19 = arith.constant 1.000000e+00 : f32
    %cst_20 = arith.constant 0.000000e+00 : f32
    %43 = vector.broadcast %cst_19 : f32 to vector<16x128xf32>
    %44 = vector.broadcast %cst_20 : f32 to vector<16x128xf32>
    %45 = arith.select %42, %43, %44 : vector<16x128xi1>, vector<16x128xf32>
    %cst_21 = arith.constant dense<0.000000e+00> : vector<128xf32>
    %46 = vector.multi_reduction <add>, %45, %cst_21 [0] : vector<16x128xf32> to vector<128xf32>
    %47 = vector.shape_cast %46 : vector<128xf32> to vector<1x128xf32>
    %cst_22 = arith.constant 1.000000e+00 : f32
    %48 = vector.broadcast %cst_22 : f32 to vector<16x128xf32>
    %49 = arith.cmpf oeq, %33, %48 : vector<16x128xf32>
    %50 = arith.andi %39, %49 : vector<16x128xi1>
    %cst_23 = arith.constant 1.000000e+00 : f32
    %cst_24 = arith.constant 0.000000e+00 : f32
    %51 = vector.broadcast %cst_23 : f32 to vector<16x128xf32>
    %52 = vector.broadcast %cst_24 : f32 to vector<16x128xf32>
    %53 = arith.select %50, %51, %52 : vector<16x128xi1>, vector<16x128xf32>
    %cst_25 = arith.constant dense<0.000000e+00> : vector<128xf32>
    %54 = vector.multi_reduction <add>, %53, %cst_25 [0] : vector<16x128xf32> to vector<128xf32>
    %55 = vector.shape_cast %54 : vector<128xf32> to vector<1x128xf32>
    %cst_26 = arith.constant 2.000000e+00 : f32
    %56 = vector.broadcast %cst_26 : f32 to vector<16x128xf32>
    %57 = arith.cmpf oeq, %33, %56 : vector<16x128xf32>
    %58 = arith.andi %39, %57 : vector<16x128xi1>
    %cst_27 = arith.constant 1.000000e+00 : f32
    %cst_28 = arith.constant 0.000000e+00 : f32
    %59 = vector.broadcast %cst_27 : f32 to vector<16x128xf32>
    %60 = vector.broadcast %cst_28 : f32 to vector<16x128xf32>
    %61 = arith.select %58, %59, %60 : vector<16x128xi1>, vector<16x128xf32>
    %cst_29 = arith.constant dense<0.000000e+00> : vector<128xf32>
    %62 = vector.multi_reduction <add>, %61, %cst_29 [0] : vector<16x128xf32> to vector<128xf32>
    %63 = vector.shape_cast %62 : vector<128xf32> to vector<1x128xf32>
    %cst_30 = arith.constant 3.000000e+00 : f32
    %64 = vector.broadcast %cst_30 : f32 to vector<16x128xf32>
    %65 = arith.cmpf oeq, %33, %64 : vector<16x128xf32>
    %66 = arith.andi %39, %65 : vector<16x128xi1>
    %cst_31 = arith.constant 1.000000e+00 : f32
    %cst_32 = arith.constant 0.000000e+00 : f32
    %67 = vector.broadcast %cst_31 : f32 to vector<16x128xf32>
    %68 = vector.broadcast %cst_32 : f32 to vector<16x128xf32>
    %69 = arith.select %66, %67, %68 : vector<16x128xi1>, vector<16x128xf32>
    %cst_33 = arith.constant dense<0.000000e+00> : vector<128xf32>
    %70 = vector.multi_reduction <add>, %69, %cst_33 [0] : vector<16x128xf32> to vector<128xf32>
    %71 = vector.shape_cast %70 : vector<128xf32> to vector<1x128xf32>
    %cst_34 = arith.constant 4.000000e+00 : f32
    %72 = vector.broadcast %cst_34 : f32 to vector<16x128xf32>
    %73 = arith.cmpf oeq, %33, %72 : vector<16x128xf32>
    %74 = arith.andi %39, %73 : vector<16x128xi1>
    %cst_35 = arith.constant 1.000000e+00 : f32
    %cst_36 = arith.constant 0.000000e+00 : f32
    %75 = vector.broadcast %cst_35 : f32 to vector<16x128xf32>
    %76 = vector.broadcast %cst_36 : f32 to vector<16x128xf32>
    %77 = arith.select %74, %75, %76 : vector<16x128xi1>, vector<16x128xf32>
    %cst_37 = arith.constant dense<0.000000e+00> : vector<128xf32>
    %78 = vector.multi_reduction <add>, %77, %cst_37 [0] : vector<16x128xf32> to vector<128xf32>
    %79 = vector.shape_cast %78 : vector<128xf32> to vector<1x128xf32>
    %cst_38 = arith.constant 5.000000e+00 : f32
    %80 = vector.broadcast %cst_38 : f32 to vector<16x128xf32>
    %81 = arith.cmpf oeq, %33, %80 : vector<16x128xf32>
    %82 = arith.andi %39, %81 : vector<16x128xi1>
    %cst_39 = arith.constant 1.000000e+00 : f32
    %cst_40 = arith.constant 0.000000e+00 : f32
    %83 = vector.broadcast %cst_39 : f32 to vector<16x128xf32>
    %84 = vector.broadcast %cst_40 : f32 to vector<16x128xf32>
    %85 = arith.select %82, %83, %84 : vector<16x128xi1>, vector<16x128xf32>
    %cst_41 = arith.constant dense<0.000000e+00> : vector<128xf32>
    %86 = vector.multi_reduction <add>, %85, %cst_41 [0] : vector<16x128xf32> to vector<128xf32>
    %87 = vector.shape_cast %86 : vector<128xf32> to vector<1x128xf32>
    %cst_42 = arith.constant 6.000000e+00 : f32
    %88 = vector.broadcast %cst_42 : f32 to vector<16x128xf32>
    %89 = arith.cmpf oeq, %33, %88 : vector<16x128xf32>
    %90 = arith.andi %39, %89 : vector<16x128xi1>
    %cst_43 = arith.constant 1.000000e+00 : f32
    %cst_44 = arith.constant 0.000000e+00 : f32
    %91 = vector.broadcast %cst_43 : f32 to vector<16x128xf32>
    %92 = vector.broadcast %cst_44 : f32 to vector<16x128xf32>
    %93 = arith.select %90, %91, %92 : vector<16x128xi1>, vector<16x128xf32>
    %cst_45 = arith.constant dense<0.000000e+00> : vector<128xf32>
    %94 = vector.multi_reduction <add>, %93, %cst_45 [0] : vector<16x128xf32> to vector<128xf32>
    %95 = vector.shape_cast %94 : vector<128xf32> to vector<1x128xf32>
    %cst_46 = arith.constant 7.000000e+00 : f32
    %96 = vector.broadcast %cst_46 : f32 to vector<16x128xf32>
    %97 = arith.cmpf oeq, %33, %96 : vector<16x128xf32>
    %98 = arith.andi %39, %97 : vector<16x128xi1>
    %cst_47 = arith.constant 1.000000e+00 : f32
    %cst_48 = arith.constant 0.000000e+00 : f32
    %99 = vector.broadcast %cst_47 : f32 to vector<16x128xf32>
    %100 = vector.broadcast %cst_48 : f32 to vector<16x128xf32>
    %101 = arith.select %98, %99, %100 : vector<16x128xi1>, vector<16x128xf32>
    %cst_49 = arith.constant dense<0.000000e+00> : vector<128xf32>
    %102 = vector.multi_reduction <add>, %101, %cst_49 [0] : vector<16x128xf32> to vector<128xf32>
    %103 = vector.shape_cast %102 : vector<128xf32> to vector<1x128xf32>
    %cst_50 = arith.constant 8.000000e+00 : f32
    %104 = vector.broadcast %cst_50 : f32 to vector<16x128xf32>
    %105 = arith.cmpf oeq, %33, %104 : vector<16x128xf32>
    %106 = arith.andi %39, %105 : vector<16x128xi1>
    %cst_51 = arith.constant 1.000000e+00 : f32
    %cst_52 = arith.constant 0.000000e+00 : f32
    %107 = vector.broadcast %cst_51 : f32 to vector<16x128xf32>
    %108 = vector.broadcast %cst_52 : f32 to vector<16x128xf32>
    %109 = arith.select %106, %107, %108 : vector<16x128xi1>, vector<16x128xf32>
    %cst_53 = arith.constant dense<0.000000e+00> : vector<128xf32>
    %110 = vector.multi_reduction <add>, %109, %cst_53 [0] : vector<16x128xf32> to vector<128xf32>
    %111 = vector.shape_cast %110 : vector<128xf32> to vector<1x128xf32>
    %cst_54 = arith.constant 9.000000e+00 : f32
    %112 = vector.broadcast %cst_54 : f32 to vector<16x128xf32>
    %113 = arith.cmpf oeq, %33, %112 : vector<16x128xf32>
    %114 = arith.andi %39, %113 : vector<16x128xi1>
    %cst_55 = arith.constant 1.000000e+00 : f32
    %cst_56 = arith.constant 0.000000e+00 : f32
    %115 = vector.broadcast %cst_55 : f32 to vector<16x128xf32>
    %116 = vector.broadcast %cst_56 : f32 to vector<16x128xf32>
    %117 = arith.select %114, %115, %116 : vector<16x128xi1>, vector<16x128xf32>
    %cst_57 = arith.constant dense<0.000000e+00> : vector<128xf32>
    %118 = vector.multi_reduction <add>, %117, %cst_57 [0] : vector<16x128xf32> to vector<128xf32>
    %119 = vector.shape_cast %118 : vector<128xf32> to vector<1x128xf32>
    %120 = tpu.concatenate %47, %55, %63, %71, %79, %87, %95, %103, %111, %119 in 0 : vector<1x128xf32>, vector<1x128xf32>, vector<1x128xf32>, vector<1x128xf32>, vector<1x128xf32>, vector<1x128xf32>, vector<1x128xf32>, vector<1x128xf32>, vector<1x128xf32>, vector<1x128xf32> -> vector<10x128xf32>
    %c0_58 = arith.constant 0 : index
    %c0_59 = arith.constant 0 : index
    %c0_60 = arith.constant 0 : index
    %121 = vector.load %arg5[%c0_58, %c0_59, %c0_60] : memref<1x10x128xf32, #tpu.memory_space<vmem>>, vector<1x10x128xf32>
    %122 = vector.shape_cast %121 : vector<1x10x128xf32> to vector<10x128xf32>
    %123 = arith.addf %122, %120 : vector<10x128xf32>
    %c0_61 = arith.constant 0 : index
    %c0_62 = arith.constant 0 : index
    %c0_63 = arith.constant 0 : index
    %124 = vector.load %arg5[%c0_61, %c0_62, %c0_63] : memref<1x10x128xf32, #tpu.memory_space<vmem>>, vector<1x10x128xf32>
    %125 = vector.shape_cast %124 : vector<1x10x128xf32> to vector<10x128xf32>
    %126 = vector.shape_cast %123 : vector<10x128xf32> to vector<1x10x128xf32>
    tpu.vector_store %arg5[%c0_61, %c0_62, %c0_63], %126 {strides = array<i32>} : memref<1x10x128xf32, #tpu.memory_space<vmem>>, vector<1x10x128xf32>,
    return
  }
  func.func @transform_0(%arg0: i32, %arg1: i32) -> (i32, i32) {
    %c1_i32 = arith.constant 1 : i32
    %0 = arith.muli %arg0, %c1_i32 : i32
    %1 = arith.addi %0, %arg1 : i32
    %c0_i32 = arith.constant 0 : i32
    %2 = arith.minsi %1, %c0_i32 : i32
    %c0_i32_0 = arith.constant 0 : i32
    %c0_i32_1 = arith.constant 0 : i32
    return %2, %c0_i32_0 : i32, i32
  }
  func.func @transform_1(%arg0: i32, %arg1: i32) -> (i32, i32) {
    %c1_i32 = arith.constant 1 : i32
    %0 = arith.muli %arg0, %c1_i32 : i32
    %1 = arith.addi %0, %arg1 : i32
    %c0_i32 = arith.constant 0 : i32
    %2 = arith.minsi %1, %c0_i32 : i32
    %c0_i32_0 = arith.constant 0 : i32
    %c0_i32_1 = arith.constant 0 : i32
    return %2, %c0_i32_0 : i32, i32
  }
  func.func @transform_2(%arg0: i32, %arg1: i32) -> (i32, i32, i32) {
    %c0_i32 = arith.constant 0 : i32
    %c0_i32_0 = arith.constant 0 : i32
    %c0_i32_1 = arith.constant 0 : i32
    return %arg0, %c0_i32, %c0_i32_0 : i32, i32, i32
  }
  func.func @transform_3(%arg0: i32, %arg1: i32) -> (i32, i32, i32) {
    %c0_i32 = arith.constant 0 : i32
    %c0_i32_0 = arith.constant 0 : i32
    %c0_i32_1 = arith.constant 0 : i32
    return %arg0, %c0_i32, %c0_i32_0 : i32, i32, i32
  }
}

</mosaic_0001>

<bundles_post_ra>
// kernel: tpu_custom_call.1
= control target key start
LH: loop header
LB: loop body
LE: loop exit
PB: predicated region body
PF: predicated region fallthrough
CT: control target
= control target key end

     0   :  { %9 = vsyncpa [#allocation3], 0  ;;  %s1293_s0 = inlined_call_operand.hbm [shape: f32[16,128], index: 0, kind: input, shape index: {}]   ;;  %s1294_s1 = inlined_call_operand.hbm [shape: f32[16,128], index: 1, kind: input, shape index: {}]   ;;  %s1295_s2 = inlined_call_operand.hbm [shape: f32[2,1,128], index: 2, kind: output, shape index: {0}]   ;;  %s1296_s3 = inlined_call_operand.vmem [shape: f32[2,10,128], index: 3, kind: output, shape index: {1}]  }
   0x1   :  { %11 = vsyncpa [#allocation3 + $0x1], 0 }
   0x2   :  { %12 = vsyncpa [#allocation6], 0 }
   0x3   :  { %14 = vsyncpa [#allocation6 + $0x1], 0 }
   0x4   :  { %15 = vsyncpa [#allocation4], 0 }
   0x5   :  { %17 = vsyncpa [#allocation4 + $0x1], 0  ;;  %s935_s12 = smov 0   ;;  %s937_s13 = smov 0  }
   0x6   :  { %s939_s14 = smov 0   ;;  %s941_s15 = smov 0  }
   0x7   :  { %s943_s16 = smov 0   ;;  %s945_s17 = smov 0  }
   0x8   :  { %s947_s18 = smov 0   ;;  %s949_s19 = smov 0  }
   0x9 LB: > { %s628_s20 = sadd.s32 4294967295, %s907_s19   ;;  %s629_s21 = sadd.s32 4294967294, %s907_s19   ;;  %s907_s19 = sphi %s949_s19, %s23_s19   ;;  %s903_s18 = sphi %s947_s18, %s1324_s18   ;;  %s899_s17 = sphi %s945_s17, %s1323_s17   ;;  %s895_s16 = sphi %s943_s16, %s1283_s16   ;;  %s891_s15 = sphi %s941_s15, %s1322_s15   ;;  %s887_s14 = sphi %s939_s14, %s1321_s14   ;;  %s883_s13 = sphi %s937_s13, %s1320_s13   ;;  %s879_s12 = sphi %s935_s12, %s1319_s12  }
   0xa   : > { %s35_s22 = sadd.s32 1, %s903_s18  ;;  %p876_p1 = scmp.ne.s32.totalorder %s895_s16, 0 }
   0xb   : > { %p37_p0 = scmp.ge.s32.totalorder %s35_s22, 2  ;;  %p56_p2 = scmp.eq.s32.totalorder %s907_s19, 0 }
   0xc   : > { %p61_p3 = scmp.ne.s32.totalorder %s895_s16, %s891_s15  ;;  %p62_p5 = scmp.eq.s32.totalorder %s628_s20, 0 }
   0xd   : > { %s1326_s22 = smov (%p37_p0, %s35_s22), 0  ;;  %p981_p4 = por %p876_p1, %p56_p2 }
   0xe   : > { %p985_p6 = por %p62_p5, %p61_p3  ;;  %s103_s25 = ssub.s32 %s903_s18, %s1326_s22 }
   0xf   : > { %p104_p7 = scmp.eq.s32.totalorder %s103_s25, 0  ;;  %s106_s26 = sadd.s32 1, %s887_s14 }
  0x10   : > { %s1300_s24 = scalar_select %p985_p6, 1, 0 }
  0x11   : > { %s993_s27 = scalar_select %p104_p7, %s887_s14, %s106_s26  }
  0x12   : > { %p116_p8 = scmp.ne.s32.totalorder %s887_s14, %s883_s13  ;;  %p117_p9 = scmp.eq.s32.totalorder %s628_s20, 1 }
  0x13   : > { %p122_p10 = scmp.ne.s32.totalorder %s883_s13, %s879_s12  ;;  %p123_p11 = scmp.eq.s32.totalorder %s629_s21, 1 }
  0x14   : > { %p999_p12 = por %p117_p9, %p116_p8  ;;  %p669_p1 = scmp.lt.s32.totalorder %s907_s19, 2 }
  0x15   : > { %p1004_p0 = por %p123_p11, %p122_p10  ;;  %s909_s30 = smov [#allocation2]  }
  0x16   : > { %s1301_s28 = scalar_select %p999_p12, 1, 0 }
  0x17   : > { %s1302_s29 = scalar_select %p1004_p0, 1, 0 }
  0x18   : > { %s183_s4 = sshll.u32 %s909_s30, 4  ;;  %p1011_p2 = pnand %p669_p1, %p981_p4  ;;  %s184_s4 = int_to_ptr.vmem [resolvable:$true] %s183_s4 }
  0x19   : > { %s746_s8 = scalar_lea.hbm %s1293_s0, 256 }
  0x1a   : > { %p747_p3 = scmp.ne.s32.totalorder %s1293_s0, %s746_s8  ;;  %p748_p5 = pneg %p1011_p2 }
  0x1b   : > { %p753_p8 = scmp.lt.s32.totalorder %s746_s8, %s746_s8 }
  0x1c   : > { %p749_p7 = pnand %p748_p5, %p747_p3 }
  0x1e   : > { %p750_p4 = pneg %p749_p7 }
  0x20   : > { %p755_p9 = pnand %p753_p8, %p750_p4 }
  0x22   : > { %758 = shalt.err (!%p755_p9)
}
  0x23   : > { %s759_s11 = scalar_lea.vmem %s184_s4, 256  ;;  %s766_s15 = scalar_lea.vmem %s184_s4, 512 }
  0x24   : > { %p760_p10 = scmp.ne.s32.totalorder %s184_s4, %s759_s11  ;;  %p767_p13 = scmp.lt.s32.totalorder %s184_s4, %s184_s4 }
  0x25   : > { %p768_p0 = scmp.lt.s32.totalorder %s766_s15, %s759_s11 }
  0x26   : > { %p762_p11 = pnand %p760_p10, %p748_p5 }
  0x27   : > { %p769_p12 = por %p768_p0, %p767_p13 }
  0x28   : > { %p763_p1 = pneg %p762_p11 }
  0x2a   : > { %p770_p6 = pnand %p769_p12, %p763_p1 }
  0x2c   : > { %773 = shalt.err (!%p770_p6)
}
  0x2d   : > { %s910_s20 = smov 128   ;;  %s911_s21 = smov 8  }
  0x2e   : > { %661 = dma.hbm_to_vmem [thread:$0]  (!%p1011_p2), %s1293_s0, 256, %s184_s4, [#allocation3], %s910_s20, %s910_s20, %s911_s21  }
  0x2f   : > { %p638_p3 = scmp.ge.s32.totalorder %s907_s19, 1  ;;  %p215_p7 = scmp.lt.s32.totalorder %s907_s19, 3 }
  0x30   : > { %s912_s30 = smov [#allocation5]   ;;  %s774_s9 = scalar_lea.hbm %s1294_s1, 256 }
  0x31   : > { %p1036_p4 = pnand %p638_p3, %p215_p7  ;;  %s207_s6 = sshll.u32 %s912_s30, 4  ;;  %s208_s6 = int_to_ptr.vmem [resolvable:$true] %s207_s6 }
  0x32   : > { %p775_p6 = scmp.ne.s32.totalorder %s1294_s1, %s774_s9  ;;  %p781_p0 = scmp.lt.s32.totalorder %s774_s9, %s774_s9 }
  0x33   : > { %s1304_s26 = scalar_select %p1036_p4, 1, 0 }
  0x34   : > { %p777_p12 = pnand %p775_p6, %p748_p5 }
  0x36   : > { %p778_p13 = pneg %p777_p12 }
  0x38   : > { %p783_p8 = pnand %p781_p0, %p778_p13 }
  0x3a   : > { %786 = shalt.err (!%p783_p8)
}
  0x3b   : > { %s787_s4 = scalar_lea.vmem %s208_s6, 256  ;;  %s794_s15 = scalar_lea.vmem %s208_s6, 512 }
  0x3c   : > { %p788_p9 = scmp.ne.s32.totalorder %s208_s6, %s787_s4  ;;  %p795_p1 = scmp.lt.s32.totalorder %s208_s6, %s208_s6 }
  0x3d   : > { %p796_p3 = scmp.lt.s32.totalorder %s794_s15, %s787_s4 }
  0x3e   : > { %p790_p10 = pnand %p788_p9, %p748_p5 }
  0x3f   : > { %p797_p7 = por %p796_p3, %p795_p1 }
  0x40   : > { %p791_p11 = pneg %p790_p10 }
  0x42   : > { %p798_p4 = pnand %p797_p7, %p791_p11 }
  0x44   : > { %801 = shalt.err (!%p798_p4)
}
  0x45   : > { %664 = dma.hbm_to_vmem [thread:$0]  (!%p1011_p2), %s1294_s1, 256, %s208_s6, [#allocation6], %s910_s20, %s910_s20, %s911_s21  }
  0x46   : > { %p1305_p6 = scmp.ne.s32.totalorder %s1304_s26, 0 }
  0x47   : > { %s221_s30 = sand.u32 (!%p1305_p6), 1, %s895_s16   ;;  %p1306_p5 = scmp.ne.s32.totalorder (!%p1305_p6), %s1300_s24, 0 }
  0x48   : > { %219 = sbr.rel (%p1305_p6) target bundleno = 151 (0x97), region = 28  ;;  %s639_s7 = sshll.u32 (!%p1305_p6), %s221_s30, 4 }
  0x49   : > { %s222_s8 = scalar_lea.sflag (!%p1305_p6), [#allocation3], %s221_s30  ;;  %s225_s9 = scalar_lea.vmem (!%p1305_p6), [#allocation2], %s639_s7 }
  0x4d   : > { %865 = dma.done.wait (%p1306_p5), %s222_s8, 256  }
  0x4e   : > { %867 = vsyncadd (%p1306_p5), %s222_s8, 4294967040  ;;  %s231_s5 = scalar_lea.sflag [#allocation6], %s221_s30  ;;  %s234_s10 = scalar_lea.vmem [#allocation5], %s639_s7 }
  0x4f   : > { %869 = dma.done.wait (%p1306_p5), %s231_s5, 256  }
  0x50   : > { %871 = vsyncadd (%p1306_p5), %s231_s5, 4294967040  ;;  %s257_s20 = sand.u32 1, %s883_s13   ;;  %p274_p2 = scmp.lt.s32.totalorder %s899_s17, 1  ;;  %v292_v0 = vlaneseq  ;;  %v913_v1 = vmov 0.0   ;;  %v286_v7 = vld [vmem:[%s225_s9] sm:$0xff]  ;;  %v287_v8 = vld [vmem:[%s225_s9 + $0x8] sm:$0xff] }
  0x51   : > { %s1072_s21 = scalar_lea.vmem [#allocation7], %s257_s20  ;;  %s643_s24 = sshll.u32 %s899_s17, 4  ;;  %v288_v9 = vld [vmem:[%s234_s10] sm:$0xff]  ;;  %v289_v10 = vld [vmem:[%s234_s10 + $0x8] sm:$0xff] }
  0x52   : > { %283 = vst [vmem:[%s1072_s21] sm:$0x1] %v913_v1  ;;  %s275_s26 = scalar_select %p274_p2, %s899_s17, 1  ;;  %v293_v2 = vshrl.u32 %v292_v0, 7  ;;  %v295_v4 = vstv %s643_s24  ;;  %v300_v11 = vsub.f32 %v286_v7, %v288_v9  ;;  %v644_v12 = vadd.f32 -7.0, %v288_v9 }
  0x53   : > { %v301_v13 = vsub.f32 %v287_v8, %v289_v10  ;;  %v645_v14 = vadd.f32 -7.0, %v289_v10  ;;  %vm326_vm2 = vcmp.ge.f32.partialorder %v288_v9, 7.0  ;;  %vm327_vm3 = vcmp.ge.f32.partialorder %v289_v10, 7.0  ;;  %s503_s23 = sshll.u32 %s1072_s21, 4  ;;  %s1164_s7 = scalar_lea.hbm %s1295_s2, %s643_s24  ;;  %s1166_s23 = int_to_ptr.vmem [resolvable:$true] %s503_s23 }
  0x54   : > { %s651_s6 = sshll.u32 %s275_s26, 4  ;;  %v294_v3 = vadd.s32 8, %v293_v2  ;;  %v296_v5 = vadd.s32 %v295_v4, %v293_v2  ;;  %v318_v16 = vmul.f32 1.25, %v644_v12  ;;  %vm330_vm5 = vcmp.le.f32.partialorder %v288_v9, 15.0  ;;  %s486_s17 = scalar_lea.sflag [#allocation4], %s257_s20 }
  0x55   : > { %s1083_s15 = scalar_lea.vmem %s1296_s3, %s651_s6  ;;  %v319_v19 = vmul.f32 1.25, %v645_v14  ;;  %vm331_vm7 = vcmp.le.f32.partialorder %v289_v10, 15.0  ;;  %s802_s8 = scalar_lea.vmem %s1166_s23, 16 }
  0x56   : > { %285 = vst [vmem:[%s1083_s15 + $0x8] sm:$0x3] %v913_v1  ;;  %v297_v6 = vadd.s32 %v295_v4, %v294_v3  ;;  %vm298_vm0 = vcmp.lt.s32.totalorder %v296_v5, 16  ;;  %v320_v21 = vfloor.f32 %v318_v16  ;;  %p803_p4 = scmp.ne.s32.totalorder %s1166_s23, %s802_s8  ;;  %p1313_p12 = scmp.ne.s32.totalorder %s1301_s28, 0 }
  0x57   : > { %v302_v15 = vsel %vm298_vm0, %v300_v11, 0.0  ;;  %v321_v22 = vfloor.f32 %v319_v19  ;;  %vm328_vm4 = vmand %vm298_vm0, %vm326_vm2  ;;  %s914_s9 = smov [#allocation7]  }
  0x58   : > { %vm299_vm1 = vcmp.lt.s32.totalorder %v297_v6, 16  ;;  %v305_v18 = vmul.f32 %v302_v15, %v302_v15  ;;  %v322_v24 = vmax.f32 %v320_v21, 0.0  ;;  %vm1091_vm8 = vmand %vm328_vm4, %vm330_vm5  ;;  %p804_p13 = pnand %p803_p4, %p1313_p12  ;;  %s806_s5 = sshll.u32 %s914_s9, 4  ;;  %s807_s5 = int_to_ptr.vmem [resolvable:$false] %s806_s5 }
  0x59   : > { %v303_v17 = vsel %vm299_vm1, %v301_v13, 0.0  ;;  %vm329_vm6 = vmand %vm299_vm1, %vm327_vm3  ;;  %v323_v25 = vmax.f32 %v321_v22, 0.0  ;;  %v304_v43 = vld [vmem:[%s1072_s21] sm:$0x1]  ;;  %s808_s10 = scalar_lea.vmem %s807_s5, 32  ;;  %p809_p8 = scmp.lt.s32.totalorder %s1166_s23, %s807_s5 }
  0x5a   : > { %v306_v20 = vmul.f32 %v303_v17, %v303_v17  ;;  %v1089_v27 = vmin.f32 %v322_v24, 9.0  ;;  %vm1097_vm9 = vmand %vm329_vm6, %vm331_vm7  ;;  %p805_p0 = pneg %p804_p13  ;;  %p810_p9 = scmp.lt.s32.totalorder %s808_s10, %s802_s8 }
  0x5b   : > { %v1095_v29 = vmin.f32 %v323_v25, 9.0 }
  0x5c   : > { %v307_v23 = vadd.f32 %v306_v20, %v305_v18  ;;  %vm334_vm10 = vcmp.eq.f32.partialorder %v1089_v27, 0.0  ;;  %vm347_vm11 = vcmp.eq.f32.partialorder %v1089_v27, 1.0  ;;  %vm360_vm0 = vcmp.eq.f32.partialorder %v1089_v27, 2.0  ;;  %p811_p10 = por %p810_p9, %p809_p8 }
  0x5d   : > { %vm335_vm12 = vcmp.eq.f32.partialorder %v1095_v29, 0.0  ;;  %vm336_vm13 = vmand %vm1091_vm8, %vm334_vm10  ;;  %vm348_vm14 = vcmp.eq.f32.partialorder %v1095_v29, 1.0  ;;  %vm361_vm1 = vcmp.eq.f32.partialorder %v1095_v29, 2.0  ;;  %vm373_vm3 = vcmp.eq.f32.partialorder %v1089_v27, 3.0 }
  0x5e   : > { %v308_v26 = vrot.slane %v307_v23, 4  ;;  %vm337_vm15 = vmand %vm1097_vm9, %vm335_vm12  ;;  %v338_v33 = vsel %vm336_vm13, 1.0, %v913_v1  ;;  %vm374_vm4 = vcmp.eq.f32.partialorder %v1095_v29, 3.0  ;;  %vm386_vm5 = vcmp.eq.f32.partialorder %v1089_v27, 4.0  ;;  %p812_p11 = pnand %p811_p10, %p805_p0 }
  0x5f   : > { %v339_v34 = vsel %vm337_vm15, 1.0, %v913_v1  ;;  %vm349_vm2 = vmand %vm1091_vm8, %vm347_vm11  ;;  %vm387_vm7 = vcmp.eq.f32.partialorder %v1095_v29, 4.0  ;;  %vm399_vm11 = vcmp.eq.f32.partialorder %v1089_v27, 5.0  ;;  %vm400_vm12 = vcmp.eq.f32.partialorder %v1095_v29, 5.0 }
  0x60   : > { %v309_v31 = vadd.f32 %v308_v26, %v307_v23  ;;  %v340_v36 = vadd.f32 %v339_v34, %v338_v33  ;;  %vm350_vm6 = vmand %vm1097_vm9, %vm348_vm14  ;;  %v351_v37 = vsel %vm349_vm2, 1.0, %v913_v1  ;;  %vm412_vm13 = vcmp.eq.f32.partialorder %v1089_v27, 6.0 }
  0x61   : > { %v352_v38 = vsel %vm350_vm6, 1.0, %v913_v1  ;;  %vm362_vm10 = vmand %vm1091_vm8, %vm360_vm0  ;;  %vm413_vm0 = vcmp.eq.f32.partialorder %v1095_v29, 6.0  ;;  %vm425_vm2 = vcmp.eq.f32.partialorder %v1089_v27, 7.0  ;;  %vm439_vm6 = vcmp.eq.f32.partialorder %v1095_v29, 8.0 }
  0x62   : > { %v310_v32 = vrot.slane %v309_v31, 2  ;;  %v341_v40 = vrot.slane %v340_v36, 4  ;;  %v353_v41 = vadd.f32 %v352_v38, %v351_v37  ;;  %vm363_vm14 = vmand %vm1097_vm9, %vm361_vm1  ;;  %v364_v42 = vsel %vm362_vm10, 1.0, %v913_v1 }
  0x63   : > { %v365_v44 = vsel %vm363_vm14, 1.0, %v913_v1  ;;  %vm375_vm15 = vmand %vm1091_vm8, %vm373_vm3  ;;  %vm464_vm10 = vcmask 1040384   ;;  %vm438_vm14 = vcmp.eq.f32.partialorder %v1089_v27, 8.0 }
  0x64   : > { %v311_v35 = vadd.f32 %v310_v32, %v309_v31  ;;  %v342_v46 = vadd.f32 %v341_v40, %v340_v36  ;;  %v354_v47 = vrot.slane %v353_v41, 4  ;;  %v366_v48 = vadd.f32 %v365_v44, %v364_v42  ;;  %vm376_vm1 = vmand %vm1097_vm9, %vm374_vm4 }
  0x65   : > { %v377_v49 = vsel %vm375_vm15, 1.0, %v913_v1  ;;  %v378_v50 = vsel %vm376_vm1, 1.0, %v913_v1  ;;  %vm388_vm3 = vmand %vm1091_vm8, %vm386_vm5  ;;  %vm451_vm15 = vcmp.eq.f32.partialorder %v1089_v27, 9.0 }
  0x66   : > { %v312_v39 = vrot.slane %v311_v35, 1  ;;  %v343_v52 = vrot.slane %v342_v46, 2  ;;  %v355_v53 = vadd.f32 %v354_v47, %v353_v41  ;;  %v367_v54 = vrot.slane %v366_v48, 4  ;;  %vm389_vm4 = vmand %vm1097_vm9, %vm387_vm7 }
  0x67   : > { %v379_v55 = vadd.f32 %v378_v50, %v377_v49  ;;  %v390_v56 = vsel %vm388_vm3, 1.0, %v913_v1  ;;  %v391_v57 = vsel %vm389_vm4, 1.0, %v913_v1  ;;  %vm401_vm5 = vmand %vm1091_vm8, %vm399_vm11  ;;  %vm466_vm7 = vcmask 1041408  }
  0x68   : > { %v313_v45 = vadd.f32 %v312_v39, %v311_v35  ;;  %v344_v58 = vadd.f32 %v343_v52, %v342_v46  ;;  %v356_v59 = vrot.slane %v355_v53, 2  ;;  %v368_v60 = vadd.f32 %v367_v54, %v366_v48  ;;  %vm402_vm1 = vmand %vm1097_vm9, %vm400_vm12 }
  0x69   : > { %v392_v61 = vadd.f32 %v391_v57, %v390_v56  ;;  %v380_v62 = vrot.slane %v379_v55, 4  ;;  %v403_v63 = vsel %vm401_vm5, 1.0, %v913_v1  ;;  %v404_v0 = vsel %vm402_vm1, 1.0, %v913_v1  ;;  %vm1186_vm11 = vmand %vm1091_vm8, %vm412_vm13 }
  0x6a   : > { %v314_v51 = vadd.f32 %v313_v45, %v304_v43  ;;  %vm452_vm3 = vcmp.eq.f32.partialorder %v1095_v29, 9.0 }
  0x6c   : > { %315 = vst [vmem:[%s1072_s21] sm:$0x1] %v314_v51 }
  0x6d   : > { %815 = shalt.err (!%p812_p11)
}
  0x6e   : > { %s816_s21 = scalar_lea.hbm %s1164_s7, 16  ;;  %s820_s24 = scalar_lea.hbm %s1295_s2, 32 }
  0x6f   : > { %p817_p1 = scmp.ne.s32.totalorder %s1164_s7, %s816_s21  ;;  %p821_p6 = scmp.lt.s32.totalorder %s1164_s7, %s1295_s2 }
  0x70   : > { %p822_p5 = scmp.lt.s32.totalorder %s820_s24, %s816_s21 }
  0x71   : > { %p818_p3 = pnand %p817_p1, %p1313_p12 }
  0x72   : > { %p823_p2 = por %p822_p5, %p821_p6 }
  0x73   : > { %p819_p7 = pneg %p818_p3 }
  0x75   : > { %p824_p4 = pnand %p823_p2, %p819_p7 }
  0x77   : > { %827 = shalt.err (!%p824_p4)
}
  0x78   : > { %656 = dma.vmem_to_hbm [thread:$0]  (%p1313_p12), %s1166_s23, 16, %s1164_s7, %s486_s17   ;;  %v345_v3 = vrot.slane %v344_v58, 1  ;;  %v357_v4 = vadd.f32 %v356_v59, %v355_v53  ;;  %v369_v5 = vrot.slane %v368_v60, 2  ;;  %v393_v6 = vrot.slane %v392_v61, 4  ;;  %vm415_vm12 = vmand %vm1097_vm9, %vm413_vm0 }
  0x79   : > { %vm468_vm13 = vcmask 1042432   ;;  %v381_v7 = vadd.f32 %v380_v62, %v379_v55  ;;  %v405_v8 = vadd.f32 %v404_v0, %v403_v63  ;;  %v416_v9 = vsel %vm1186_vm11, 1.0, %v913_v1  ;;  %vm427_vm4 = vmand %vm1091_vm8, %vm425_vm2 }
  0x7a   : > { %v417_v10 = vsel %vm415_vm12, 1.0, %v913_v1  ;;  %vm470_vm5 = vcmask 1043456   ;;  %v346_v11 = vadd.f32 %v345_v3, %v344_v58  ;;  %v358_v12 = vrot.slane %v357_v4, 1  ;;  %vm440_vm2 = vmand %vm1091_vm8, %vm438_vm14 }
  0x7b   : > { %v370_v13 = vadd.f32 %v369_v5, %v368_v60  ;;  %v394_v14 = vadd.f32 %v393_v6, %v392_v61  ;;  %vm1314_vm0 = vcmp.eq.f32.partialorder %v1095_v29, 7.0  ;;  %v382_v15 = vrot.slane %v381_v7, 2  ;;  %vm1239_vm11 = vmand %vm1097_vm9, %vm439_vm6 }
  0x7c   : > { %vm428_vm1 = vmand %vm1097_vm9, %vm1314_vm0  ;;  %v406_v16 = vrot.slane %v405_v8, 4  ;;  %v418_v17 = vadd.f32 %v417_v10, %v416_v9  ;;  %v429_v18 = vsel %vm427_vm4, 1.0, %v913_v1  ;;  %v359_v19 = vadd.f32 %v358_v12, %v357_v4  ;;  %v480_v10 = vld [vmem:[%s1083_s15 + $0x8] sm:$0x3] }
  0x7d   : > { %v371_v20 = vrot.slane %v370_v13, 1  ;;  %v395_v21 = vrot.slane %v394_v14, 2  ;;  %v430_v22 = vsel %vm428_vm1, 1.0, %v913_v1  ;;  %v383_v24 = vadd.f32 %v382_v15, %v381_v7  ;;  %vm453_vm14 = vmand %vm1091_vm8, %vm451_vm15 }
  0x7e   : > { %v407_v25 = vadd.f32 %v406_v16, %v405_v8  ;;  %v419_v26 = vrot.slane %v418_v17, 4  ;;  %v431_v31 = vadd.f32 %v430_v22, %v429_v18  ;;  %v465_v34 = vsel %vm464_vm10, %v346_v11, %v359_v19  ;;  %vm454_vm6 = vmand %vm1097_vm9, %vm452_vm3 }
  0x7f   : > { %v372_v32 = vadd.f32 %v371_v20, %v370_v13  ;;  %v396_v33 = vadd.f32 %v395_v21, %v394_v14  ;;  %v442_v35 = vsel %vm440_vm2, 1.0, %v913_v1  ;;  %v384_v36 = vrot.slane %v383_v24, 1 }
  0x80   : > { %v408_v37 = vrot.slane %v407_v25, 2  ;;  %v420_v38 = vadd.f32 %v419_v26, %v418_v17  ;;  %v432_v39 = vrot.slane %v431_v31, 4  ;;  %v443_v28 = vsel %vm1239_vm11, 1.0, %v913_v1 }
  0x81   : > { %v397_v40 = vrot.slane %v396_v33, 1  ;;  %v467_v27 = vsel %vm466_vm7, %v465_v34, %v372_v32  ;;  %v455_v41 = vsel %vm453_vm14, 1.0, %v913_v1  ;;  %v385_v42 = vadd.f32 %v384_v36, %v383_v24 }
  0x82   : > { %v409_v43 = vadd.f32 %v408_v37, %v407_v25  ;;  %v421_v44 = vrot.slane %v420_v38, 2  ;;  %v433_v45 = vadd.f32 %v432_v39, %v431_v31  ;;  %v444_v47 = vadd.f32 %v443_v28, %v442_v35 }
  0x83   : > { %v398_v46 = vadd.f32 %v397_v40, %v396_v33  ;;  %v456_v29 = vsel %vm454_vm6, 1.0, %v913_v1  ;;  %v469_v50 = vsel %vm468_vm13, %v467_v27, %v385_v42  ;;  %vm472_vm8 = vcmask 1044480  }
  0x84   : > { %v410_v48 = vrot.slane %v409_v43, 1  ;;  %v422_v30 = vadd.f32 %v421_v44, %v420_v38  ;;  %v434_v49 = vrot.slane %v433_v45, 2  ;;  %v445_v52 = vrot.slane %v444_v47, 4 }
  0x85   : > { %v471_v51 = vsel %vm470_vm5, %v469_v50, %v398_v46  ;;  %v457_v53 = vadd.f32 %v456_v29, %v455_v41  ;;  %vm474_vm9 = vcmask 1045504   ;;  %vm476_vm7 = vcmask 1046528  }
  0x86   : > { %v411_v54 = vadd.f32 %v410_v48, %v409_v43  ;;  %v423_v55 = vrot.slane %v422_v30, 1  ;;  %v435_v56 = vadd.f32 %v434_v49, %v433_v45  ;;  %v446_v57 = vadd.f32 %v445_v52, %v444_v47 }
  0x87   : > { %v458_v58 = vrot.slane %v457_v53, 4 }
  0x88   : > { %v424_v59 = vadd.f32 %v423_v55, %v422_v30  ;;  %v436_v60 = vrot.slane %v435_v56, 1  ;;  %v473_v1 = vsel %vm472_vm8, %v471_v51, %v411_v54  ;;  %v447_v61 = vrot.slane %v446_v57, 2 }
  0x89   : > { %v459_v62 = vadd.f32 %v458_v58, %v457_v53 }
  0x8a   : > { %v437_v63 = vadd.f32 %v436_v60, %v435_v56  ;;  %v475_v0 = vsel %vm474_vm9, %v473_v1, %v424_v59  ;;  %v448_v2 = vadd.f32 %v447_v61, %v446_v57 }
  0x8b   : > { %v460_v3 = vrot.slane %v459_v62, 2 }
  0x8c   : > { %v477_v4 = vsel %vm476_vm7, %v475_v0, %v437_v63  ;;  %v449_v5 = vrot.slane %v448_v2, 1 }
  0x8d   : > { %v461_v6 = vadd.f32 %v460_v3, %v459_v62  ;;  %483 = vst [vmem:[%s1083_s15] sm:$0xff] %v477_v4 }
  0x8e   : > { %v450_v7 = vadd.f32 %v449_v5, %v448_v2 }
  0x8f   : > { %v462_v8 = vrot.slane %v461_v6, 1 }
  0x91   : > { %v463_v9 = vadd.f32 %v462_v8, %v461_v6 }
  0x93   : > { %v478_v11 = vsel %vm464_vm10, %v450_v7, %v463_v9 }
  0x94   : > { %v482_v12 = vadd.f32 %v480_v10, %v478_v11 }
  0x96   : > { %484 = vst [vmem:[%s1083_s15 + $0x8] sm:$0x3] %v482_v12 }
  0x97 PF: > { %s518_s28 = sand.u32 1, %s879_s12   ;;  %p1317_p12 = scmp.ne.s32.totalorder %s1302_s29, 0 }
  0x98   : > { %p1318_p13 = scmp.ge.s32.totalorder %s907_s19, 2  ;;  %s519_s4 = scalar_lea.sflag [#allocation4], %s518_s28 }
  0x9a   : > { %p666_p0 = pnand %p1318_p13, %p1317_p12 }
  0x9c   : > { %p667_p8 = pneg %p666_p0 }
  0x9e   : > { %873 = dma.done.wait (%p667_p8), %s519_s4, 16  }
  0x9f   : > { %875 = vsyncadd (%p667_p8), %s519_s4, 4294967280  ;;  %s23_s19 = sadd.s32 1, %s907_s19   ;;  %s1319_s12 = smov %s883_s13 }
  0xa0   : > { %p20_p9 = scmp.ge.s32.totalorder %s23_s19, 4   ;;  %s1320_s13 = smov %s887_s14 }
  0xa1   : > { %s1321_s14 = smov %s993_s27  ;;  %s1322_s15 = smov %s895_s16 }
  0xa2   : > { %s1283_s16 = smov 0   ;;  %s1323_s17 = smov %s903_s18 }
  0xa3   : > { %s1324_s18 = smov %s1326_s22  ;;  %22 = sbr.rel (!%p20_p9) target bundleno = 9 (0x9), region = 102 }
  0xa8   :  { %531 = vsyncpa [#allocation3], 1 }
  0xa9   :  { %533 = vsyncpa [#allocation3 + $0x1], 1 }
  0xaa   :  { %534 = vsyncpa [#allocation6], 1 }
  0xab   :  { %536 = vsyncpa [#allocation6 + $0x1], 1 }
  0xac   :  { %537 = vsyncpa [#allocation4], 1 }
  0xad   :  { %539 = vsyncpa [#allocation4 + $0x1], 1 }

</bundles_post_ra>
